<compile_context>
chip_gen: v6e
topology: v6e:2x2x1
jax: 0.10.0
libtpu: 0.0.40
codegen_flags: <defaults>
</compile_context>

<pallas_src>
import functools

import jax
import jax.numpy as jnp
from jax.experimental import pallas as pl
from jax.experimental.pallas import tpu as pltpu


def _ce_kernel(pred_ref, tgt_ref, sum_ref, cnt_ref, *, ignore_index, hw, tile_hw):
    """One (image, pixel-tile) block -> partial loss sum + valid-pixel count."""
    logits = pred_ref[...].astype(jnp.float32)            # (C, T)  classes=sublane
    tgt = tgt_ref[...]                                     # (1, T)  int32, lane-dense

    # numerically-stable log-sum-exp over the class (sublane) axis
    m = jnp.max(logits, axis=0, keepdims=True)             # (1, T)
    lse = jnp.log(jnp.sum(jnp.exp(logits - m), axis=0, keepdims=True)) + m

    # gather the target-class logit via one-hot compare (no dynamic gather)
    cls_ids = jax.lax.broadcasted_iota(jnp.int32, logits.shape, 0)  # (C, T)
    picked = jnp.sum(jnp.where(cls_ids == tgt, logits, 0.0),
                     axis=0, keepdims=True)                 # (1, T)

    valid = tgt != ignore_index                             # (1, T) bool
    if hw % tile_hw != 0:
        # mask out-of-bounds pixels of the ragged last tile (no pad copy in HBM)
        t = pl.program_id(1)
        pix = t * tile_hw + jax.lax.broadcasted_iota(jnp.int32, tgt.shape, 1)
        valid = jnp.logical_and(valid, pix < hw)

    loss = jnp.where(valid, lse - picked, 0.0)              # (1, T)

    # per-block partials; final (tiny) reduction done outside the kernel
    sum_ref[...] = jnp.sum(loss, axis=1, keepdims=True)                      # (1, 1)
    cnt_ref[...] = jnp.sum(valid.astype(jnp.float32), axis=1, keepdims=True)  # (1, 1)


def cross_entropy_loss(pred, target, *, ignore_index=255,
                       max_block_bytes=2 * 1024 * 1024):
    """pred: (N, C, H, W) float; target: (N, H, W) int. Returns scalar mean loss."""
    # TODO(synk): per-class `weight` (module default is None) not implemented.
    N, C, H, W = pred.shape
    HW = H * W

    logits = pred.reshape(N, C, HW)                      # free reshape, native layout
    tgt = target.reshape(N, 1, HW).astype(jnp.int32)     # lane-dense target

    # Tile the pixel (lane) axis: biggest tile under ~max_block_bytes of logits,
    # multiple of 128 (or the full axis if it already fits).
    bytes_per_px = C * jnp.dtype(pred.dtype).itemsize
    tile_hw = max(128, (max_block_bytes // max(bytes_per_px, 1)) // 128 * 128)
    tile_hw = min(tile_hw, 32768)
    if HW <= tile_hw:
        tile_hw = HW
    n_tiles = pl.cdiv(HW, tile_hw)

    sum_p, cnt_p = pl.pallas_call(
        functools.partial(_ce_kernel, ignore_index=ignore_index,
                          hw=HW, tile_hw=tile_hw),
        grid=(N, n_tiles),
        in_specs=[
            pl.BlockSpec((None, C, tile_hw), lambda n, t: (n, 0, t)),
            pl.BlockSpec((None, 1, tile_hw), lambda n, t: (n, 0, t)),
        ],
        out_specs=[
            pl.BlockSpec((None, None, 1, 1), lambda n, t: (n, t, 0, 0)),
            pl.BlockSpec((None, None, 1, 1), lambda n, t: (n, t, 0, 0)),
        ],
        out_shape=[
            jax.ShapeDtypeStruct((N, n_tiles, 1, 1), jnp.float32),
            jax.ShapeDtypeStruct((N, n_tiles, 1, 1), jnp.float32),
        ],
        compiler_params=pltpu.CompilerParams(
            dimension_semantics=("parallel", "parallel")),
    )(logits, tgt)

    # mean over non-ignored pixels (matches F.cross_entropy reduction='mean';
    # returns NaN if every pixel is ignored, same as PyTorch)
    return jnp.sum(sum_p) / jnp.sum(cnt_p)


def _reference(pred, target, ignore_index=255):
    N, C, H, W = pred.shape
    logits = jnp.transpose(pred, (0, 2, 3, 1)).reshape(-1, C).astype(jnp.float32)
    tgt = target.reshape(-1)
    lse = jax.nn.logsumexp(logits, axis=-1)
    safe_tgt = jnp.where(tgt == ignore_index, 0, tgt)
    picked = jnp.take_along_axis(logits, safe_tgt[:, None], axis=-1)[:, 0]
    valid = tgt != ignore_index
    loss = jnp.where(valid, lse - picked, 0.0)
    return jnp.sum(loss) / jnp.sum(valid.astype(jnp.float32))


if __name__ == "__main__":
    key = jax.random.PRNGKey(0)
    k1, k2, k3 = jax.random.split(key, 3)

    N, C, H, W = 2, 4, 16, 16
    pred = jax.random.normal(k1, (N, C, H, W), dtype=jnp.float32)
    target = jax.random.randint(k2, (N, H, W), 0, C, dtype=jnp.int32)
    # sprinkle some ignore_index pixels
    ignore_mask = jax.random.uniform(k3, (N, H, W)) < 0.1
    target = jnp.where(ignore_mask, 255, target)

    loss = cross_entropy_loss(pred, target)
    jax.block_until_ready(loss)

    ref = _reference(pred, target)
    assert jnp.allclose(loss, ref, rtol=1e-5, atol=1e-5), (loss, ref)

    print("KERNEL_OK")
</pallas_src>

<mosaic_0001>
module attributes {stable_mosaic.version = 11 : i64} {
  func.func @_ce_kernel(%arg0: i32, %arg1: i32, %arg2: memref<1x4x256xf32, #tpu.memory_space<vmem>>, %arg3: memref<1x1x256xi32, #tpu.memory_space<vmem>>, %arg4: memref<1x1x1x1xf32, #tpu.memory_space<vmem>>, %arg5: memref<1x1x1x1xf32, #tpu.memory_space<vmem>>) attributes {dimension_semantics = [#tpu.dimension_semantics<parallel>, #tpu.dimension_semantics<parallel>], iteration_bounds = array<i64: 2, 1>, scalar_prefetch = 0 : i64, scratch_operands = 0 : i64, tpu.core_type = #tpu.core_type<tc>, window_params = [{transform_indices = @transform_0, window_bounds = array<i64: 1, 4, 256>}, {transform_indices = @transform_1, window_bounds = array<i64: 1, 1, 256>}, {transform_indices = @transform_2, window_bounds = array<i64: 1, 1, 1, 1>}, {transform_indices = @transform_3, window_bounds = array<i64: 1, 1, 1, 1>}]} {
    %c0 = arith.constant 0 : index
    %c0_0 = arith.constant 0 : index
    %c0_1 = arith.constant 0 : index
    %0 = vector.load %arg2[%c0, %c0_0, %c0_1] : memref<1x4x256xf32, #tpu.memory_space<vmem>>, vector<1x4x256xf32>
    %1 = vector.shape_cast %0 : vector<1x4x256xf32> to vector<4x256xf32>
    %c0_2 = arith.constant 0 : index
    %c0_3 = arith.constant 0 : index
    %c0_4 = arith.constant 0 : index
    %2 = vector.load %arg3[%c0_2, %c0_3, %c0_4] : memref<1x1x256xi32, #tpu.memory_space<vmem>>, vector<1x1x256xi32>
    %3 = vector.shape_cast %2 : vector<1x1x256xi32> to vector<1x256xi32>
    %cst = arith.constant dense<0xFF800000> : vector<256xf32>
    %4 = vector.multi_reduction <maximumf>, %1, %cst [0] : vector<4x256xf32> to vector<256xf32>
    %5 = vector.shape_cast %4 : vector<256xf32> to vector<1x256xf32>
    %6 = vector.broadcast %5 : vector<1x256xf32> to vector<4x256xf32>
    %7 = arith.subf %1, %6 : vector<4x256xf32>
    %8 = math.exp %7 : vector<4x256xf32>
    %cst_5 = arith.constant dense<0.000000e+00> : vector<256xf32>
    %9 = vector.multi_reduction <add>, %8, %cst_5 [0] : vector<4x256xf32> to vector<256xf32>
    %10 = vector.shape_cast %9 : vector<256xf32> to vector<1x256xf32>
    %11 = math.log %10 : vector<1x256xf32>
    %12 = arith.addf %11, %5 : vector<1x256xf32>
    %13 = tpu.iota {dimensions = array<i32: 0>} : vector<4x256xi32>
    %14 = vector.broadcast %3 : vector<1x256xi32> to vector<4x256xi32>
    %15 = arith.cmpi eq, %13, %14 : vector<4x256xi32>
    %cst_6 = arith.constant 0.000000e+00 : f32
    %16 = vector.broadcast %cst_6 : f32 to vector<4x256xf32>
    %17 = arith.select %15, %1, %16 : vector<4x256xi1>, vector<4x256xf32>
    %cst_7 = arith.constant dense<0.000000e+00> : vector<256xf32>
    %18 = vector.multi_reduction <add>, %17, %cst_7 [0] : vector<4x256xf32> to vector<256xf32>
    %19 = vector.shape_cast %18 : vector<256xf32> to vector<1x256xf32>
    %c255_i32 = arith.constant 255 : i32
    %20 = vector.broadcast %c255_i32 : i32 to vector<1x256xi32>
    %21 = arith.cmpi ne, %3, %20 : vector<1x256xi32>
    %22 = arith.subf %12, %19 : vector<1x256xf32>
    %cst_8 = arith.constant 0.000000e+00 : f32
    %23 = vector.broadcast %cst_8 : f32 to vector<1x256xf32>
    %24 = arith.select %21, %22, %23 : vector<1x256xi1>, vector<1x256xf32>
    %cst_9 = arith.constant dense<0.000000e+00> : vector<1xf32>
    %25 = vector.multi_reduction <add>, %24, %cst_9 [1] : vector<1x256xf32> to vector<1xf32>
    %26 = vector.shape_cast %25 : vector<1xf32> to vector<1x1xf32>
    %c0_10 = arith.constant 0 : index
    %c0_11 = arith.constant 0 : index
    %c0_12 = arith.constant 0 : index
    %c0_13 = arith.constant 0 : index
    %27 = vector.load %arg4[%c0_10, %c0_11, %c0_12, %c0_13] : memref<1x1x1x1xf32, #tpu.memory_space<vmem>>, vector<1x1x1x1xf32>
    %28 = vector.shape_cast %27 : vector<1x1x1x1xf32> to vector<1x1xf32>
    %29 = vector.shape_cast %26 : vector<1x1xf32> to vector<1x1x1x1xf32>
    tpu.vector_store %arg4[%c0_10, %c0_11, %c0_12, %c0_13], %29 {strides = array<i32>} : memref<1x1x1x1xf32, #tpu.memory_space<vmem>>, vector<1x1x1x1xf32>,
    %30 = arith.extui %21 : vector<1x256xi1> to vector<1x256xi32>
    %31 = arith.sitofp %30 : vector<1x256xi32> to vector<1x256xf32>
    %cst_14 = arith.constant dense<0.000000e+00> : vector<1xf32>
    %32 = vector.multi_reduction <add>, %31, %cst_14 [1] : vector<1x256xf32> to vector<1xf32>
    %33 = vector.shape_cast %32 : vector<1xf32> to vector<1x1xf32>
    %c0_15 = arith.constant 0 : index
    %c0_16 = arith.constant 0 : index
    %c0_17 = arith.constant 0 : index
    %c0_18 = arith.constant 0 : index
    %34 = vector.load %arg5[%c0_15, %c0_16, %c0_17, %c0_18] : memref<1x1x1x1xf32, #tpu.memory_space<vmem>>, vector<1x1x1x1xf32>
    %35 = vector.shape_cast %34 : vector<1x1x1x1xf32> to vector<1x1xf32>
    %36 = vector.shape_cast %33 : vector<1x1xf32> to vector<1x1x1x1xf32>
    tpu.vector_store %arg5[%c0_15, %c0_16, %c0_17, %c0_18], %36 {strides = array<i32>} : memref<1x1x1x1xf32, #tpu.memory_space<vmem>>, vector<1x1x1x1xf32>,
    return
  }
  func.func @transform_0(%arg0: i32, %arg1: i32) -> (i32, i32, i32) {
    %c0_i32 = arith.constant 0 : i32
    %c0_i32_0 = arith.constant 0 : i32
    return %arg0, %c0_i32, %arg1 : i32, i32, i32
  }
  func.func @transform_1(%arg0: i32, %arg1: i32) -> (i32, i32, i32) {
    %c0_i32 = arith.constant 0 : i32
    %c0_i32_0 = arith.constant 0 : i32
    return %arg0, %c0_i32, %arg1 : i32, i32, i32
  }
  func.func @transform_2(%arg0: i32, %arg1: i32) -> (i32, i32, i32, i32) {
    %c0_i32 = arith.constant 0 : i32
    %c0_i32_0 = arith.constant 0 : i32
    %c0_i32_1 = arith.constant 0 : i32
    return %arg0, %arg1, %c0_i32, %c0_i32_0 : i32, i32, i32, i32
  }
  func.func @transform_3(%arg0: i32, %arg1: i32) -> (i32, i32, i32, i32) {
    %c0_i32 = arith.constant 0 : i32
    %c0_i32_0 = arith.constant 0 : i32
    %c0_i32_1 = arith.constant 0 : i32
    return %arg0, %arg1, %c0_i32, %c0_i32_0 : i32, i32, i32, i32
  }
}

</mosaic_0001>

<bundles_post_ra>
// kernel: tpu_custom_call.1
= control target key start
LH: loop header
LB: loop body
LE: loop exit
PB: predicated region body
PF: predicated region fallthrough
CT: control target
= control target key end

     0   :  { %9 = vsyncpa [#allocation3], 0  ;;  %s919_s0 = inlined_call_operand.hbm [shape: f32[2,4,256], index: 0, kind: input, shape index: {}]   ;;  %s920_s1 = inlined_call_operand.hbm [shape: s32[2,1,256], index: 1, kind: input, shape index: {}]   ;;  %s921_s2 = inlined_call_operand.vmem [shape: f32[2,1,1,1], index: 2, kind: output, shape index: {0}]   ;;  %s922_s3 = inlined_call_operand.vmem [shape: f32[2,1,1,1], index: 3, kind: output, shape index: {1}]  }
   0x1   :  { %11 = vsyncpa [#allocation3 + $0x1], 0 }
   0x2   :  { %12 = vsyncpa [#allocation5], 0 }
   0x3   :  { %14 = vsyncpa [#allocation5 + $0x1], 0  ;;  %s772_s12 = smov 0   ;;  %s774_s13 = smov 0  }
   0x4   :  { %s776_s14 = smov 0   ;;  %s778_s15 = smov 0  }
   0x5   :  { %s780_s16 = smov 0   ;;  %s782_s17 = smov 0  }
   0x6 LB: > { %s549_s18 = sadd.s32 4294967295, %s746_s17   ;;  %s32_s19 = sadd.s32 1, %s742_s16  ;;  %s746_s17 = sphi %s782_s17, %s20_s17   ;;  %s742_s16 = sphi %s780_s16, %s931_s16   ;;  %s738_s15 = sphi %s778_s15, %s930_s15   ;;  %s734_s14 = sphi %s776_s14, %s929_s14   ;;  %s730_s13 = sphi %s774_s13, %s928_s13   ;;  %s726_s12 = sphi %s772_s12, %s927_s12  }
   0x7   : > { %p34_p0 = scmp.ge.s32.totalorder %s32_s19, 2  ;;  %s41_s20 = sadd.s32 1, %s734_s14 }
   0x8   : > { %p48_p1 = scmp.ne.s32.totalorder %s734_s14, %s730_s13  ;;  %p49_p2 = scmp.eq.s32.totalorder %s746_s17, 0 }
   0x9   : > { %s933_s19 = smov (%p34_p0, %s32_s19), 0  ;;  %p54_p4 = scmp.ne.s32.totalorder %s730_s13, %s726_s12 }
   0xa   : > { %p808_p3 = por %p49_p2, %p48_p1  ;;  %s36_s22 = ssub.s32 %s742_s16, %s933_s19 }
   0xb   : > { %p55_p5 = scmp.eq.s32.totalorder %s549_s18, 0  ;;  %p39_p6 = scmp.eq.s32.totalorder %s36_s22, 0 }
   0xc   : > { %p578_p8 = scmp.lt.s32.totalorder %s746_s17, 2  ;;  %s824_s25 = sand.u32 1, %s734_s14  }
   0xd   : > { %p815_p7 = por %p55_p5, %p54_p4  ;;  %s565_s26 = sshll.u32 %s742_s16, 7 }
   0xe   : > { %s821_s24 = scalar_select %p39_p6, %s734_s14, %s41_s20  }
   0xf   : > { %s553_s27 = sshll.u32 %s824_s25, 3  ;;  %s174_s30 = scalar_lea.hbm %s919_s0, %s565_s26 }
  0x10   : > { %s166_s4 = scalar_lea.vmem [#allocation2], %s553_s27  ;;  %p833_p9 = pnand %p578_p8, %p808_p3 }
  0x11   : > { %s176_s5 = sshll.u32 %s166_s4, 4  ;;  %p559_p10 = scmp.ge.s32.totalorder %s746_s17, 1  ;;  %s177_s5 = int_to_ptr.vmem [resolvable:$true] %s176_s5 }
  0x12   : > { %p202_p11 = scmp.lt.s32.totalorder %s746_s17, 3  ;;  %s163_s7 = scalar_lea.sflag [#allocation3], %s824_s25 }
  0x13   : > { %p638_p12 = pneg %p833_p9  ;;  %s649_s8 = scalar_lea.vmem %s177_s5, 128 }
  0x14   : > { %p650_p13 = scmp.ne.s32.totalorder %s177_s5, %s649_s8  ;;  %s748_s9 = smov [#allocation2]  }
  0x15   : > { %s654_s10 = sshll.u32 %s748_s9, 4  ;;  %s655_s10 = int_to_ptr.vmem [resolvable:$false] %s654_s10 }
  0x16   : > { %p652_p0 = pnand %p650_p13, %p638_p12  ;;  %s656_s11 = scalar_lea.vmem %s655_s10, 256 }
  0x17   : > { %p657_p2 = scmp.lt.s32.totalorder %s177_s5, %s655_s10  ;;  %p658_p3 = scmp.lt.s32.totalorder %s656_s11, %s649_s8 }
  0x18   : > { %p653_p1 = pneg %p652_p0 }
  0x19   : > { %p659_p4 = por %p658_p3, %p657_p2 }
  0x1b   : > { %p660_p5 = pnand %p659_p4, %p653_p1 }
  0x1d   : > { %663 = shalt.err (!%p660_p5)
}
  0x1e   : > { %574 = dma.hbm_to_vmem [thread:$0]  (!%p833_p9), %s174_s30, 128, %s177_s5, %s163_s7  }
  0x1f   : > { %p851_p6 = pnand %p559_p10, %p202_p11  ;;  %s556_s18 = sshll.u32 %s824_s25, 1 }
  0x20   : > { %s566_s20 = sshll.u32 %s742_s16, 5  ;;  %s187_s27 = scalar_lea.vmem [#allocation4], %s556_s18 }
  0x21   : > { %s195_s26 = scalar_lea.hbm %s920_s1, %s566_s20  ;;  %s197_s28 = sshll.u32 %s187_s27, 4  ;;  %s198_s28 = int_to_ptr.vmem [resolvable:$true] %s197_s28 }
  0x22   : > { %s184_s29 = scalar_lea.sflag [#allocation5], %s824_s25  ;;  %s677_s4 = scalar_lea.vmem %s198_s28, 32 }
  0x23   : > { %p678_p8 = scmp.ne.s32.totalorder %s198_s28, %s677_s4  ;;  %s749_s30 = smov [#allocation4]  }
  0x24   : > { %s682_s5 = sshll.u32 %s749_s30, 4  ;;  %s683_s5 = int_to_ptr.vmem [resolvable:$false] %s682_s5 }
  0x25   : > { %p680_p13 = pnand %p678_p8, %p638_p12  ;;  %s684_s7 = scalar_lea.vmem %s683_s5, 64 }
  0x26   : > { %p685_p10 = scmp.lt.s32.totalorder %s198_s28, %s683_s5  ;;  %p686_p11 = scmp.lt.s32.totalorder %s684_s7, %s677_s4 }
  0x27   : > { %p681_p0 = pneg %p680_p13 }
  0x28   : > { %p687_p1 = por %p686_p11, %p685_p10 }
  0x2a   : > { %p688_p2 = pnand %p687_p1, %p681_p0 }
  0x2c   : > { %691 = shalt.err (!%p688_p2)
}
  0x2d   : > { %577 = dma.hbm_to_vmem [thread:$0]  (!%p833_p9), %s195_s26, 32, %s198_s28, %s184_s29  }
  0x2e   : > { %206 = sbr.rel (%p851_p6) target bundleno = 281 (0x119), region = 28  ;;  %s208_s25 = sand.u32 (!%p851_p6), 1, %s730_s13  }
  0x2f   : > { %s560_s8 = sshll.u32 (!%p851_p6), %s208_s25, 3  ;;  %s209_s9 = scalar_lea.sflag (!%p851_p6), [#allocation3], %s208_s25 }
  0x30   : > { %s212_s10 = scalar_lea.vmem (!%p851_p6), [#allocation2], %s560_s8 }
  0x33   : > { %717 = dma.done.wait (%p815_p7), %s209_s9, 128  }
  0x34   : > { %719 = vsyncadd (%p815_p7), %s209_s9, 4294967168  ;;  %s561_s11 = sshll.u32 %s208_s25, 1  ;;  %s218_s18 = scalar_lea.sflag [#allocation5], %s208_s25 }
  0x35   : > { %s221_s20 = scalar_lea.vmem [#allocation4], %s561_s11 }
  0x36   : > { %721 = dma.done.wait (%p815_p7), %s218_s18, 32  }
  0x37   : > { %723 = vsyncadd (%p815_p7), %s218_s18, 4294967264  ;;  %vm275_vm0 = vcmask 1043456   ;;  %v270_v0 = vld [vmem:[%s212_s10] sm:$0xff]  ;;  %v320_v18 = vlaneseq  ;;  %v271_v22 = vld [vmem:[%s221_s20] sm:$0x3]  ;;  %vm381_vm4 = vcmask 1040384  }
  0x38   : > { %v273_v1 = vcombine.high %v270_v0, %v270_v0  ;;  %v276_v2 = vsel %vm275_vm0, %v270_v0, -inf  ;;  %v750_v56 = vmov 1966171168   ;;  %vm348_vm3 = vcmp.ne.s32.totalorder %v271_v22, 255  ;;  %p258_p7 = scmp.lt.s32.totalorder %s738_s15, 1 }
  0x39   : > { %v277_v3 = vrot.slane %v276_v2, 4  ;;  %v321_v20 = vshrl.u32 %v320_v18, 7  ;;  %v355_v57 = vunpack.c.l.s4 %v750_v56  ;;  %vm387_vm5 = vcmask 0  }
  0x3a   : > { %v283_v4 = vsel %vm275_vm0, %v273_v1, -inf  ;;  %s935_s15 = smov (!%p258_p7, %s738_s15), 1 }
  0x3b   : > { %v278_v5 = vmax.f32 %v276_v2, %v277_v3  ;;  %v284_v6 = vrot.slane %v283_v4, 4  ;;  %v879_v21 = vsub.s32 0, %v321_v20  ;;  %v881_v23 = vsub.s32 1, %v321_v20  ;;  %s263_s12 = scalar_lea.vmem %s921_s2, %s935_s15  ;;  %s269_s26 = scalar_lea.vmem %s922_s3, %s935_s15 }
  0x3d   : > { %v279_v7 = vrot.slane %v278_v5, 2  ;;  %v285_v8 = vmax.f32 %v283_v4, %v284_v6  ;;  %v325_v24 = vrot.slane %v271_v22, %v879_v21  ;;  %v329_v25 = vrot.slane %v271_v22, %v881_v23 }
  0x3f   : > { %v280_v9 = vmax.f32 %v278_v5, %v279_v7  ;;  %v286_v10 = vrot.slane %v285_v8, 2  ;;  %vm330_vm1 = vcmp.eq.s32.totalorder %v321_v20, %v325_v24  ;;  %vm331_vm2 = vcmp.eq.s32.totalorder %v321_v20, %v329_v25 }
  0x40   : > { %v332_v30 = vsel %vm330_vm1, %v270_v0, 0.0  ;;  %v333_v34 = vsel %vm331_vm2, %v273_v1, 0.0  ;;  %v356_v1 = vunpack.c.0.s8 %v355_v57 }
  0x41   : > { %v281_v11 = vrot.slane %v280_v9, 1  ;;  %v287_v12 = vmax.f32 %v285_v8, %v286_v10  ;;  %v334_v35 = vsel %vm275_vm0, %v332_v30, 0.0  ;;  %v341_v38 = vsel %vm275_vm0, %v333_v34, 0.0 }
  0x42   : > { %v335_v41 = vrot.slane %v334_v35, 4  ;;  %v342_v44 = vrot.slane %v341_v38, 4  ;;  %v359_v5 = vsub.s32 %v356_v1, %v321_v20  ;;  %v751_v8 = vmov 0.0  }
  0x43   : > { %v282_v13 = vmax.f32 %v280_v9, %v281_v11  ;;  %v288_v14 = vrot.slane %v287_v12, 1  ;;  %v562_v9 = vsel %vm348_vm3, 1.0, %v751_v8 }
  0x44   : > { %v336_v47 = vadd.f32 %v335_v41, %v334_v35  ;;  %v343_v49 = vadd.f32 %v342_v44, %v341_v38  ;;  %v395_v11 = vrot.slane %v562_v9, %v879_v21 }
  0x45   : > { %v289_v15 = vmax.f32 %v287_v12, %v288_v14  ;;  %v399_v12 = vrot.slane %v562_v9, %v881_v23 }
  0x46   : > { %v337_v50 = vrot.slane %v336_v47, 2  ;;  %v344_v51 = vrot.slane %v343_v49, 2  ;;  %v402_v18 = vsel %vm381_vm4, %v395_v11, 0.0 }
  0x47   : > { %v292_v16 = vcombine.low %v282_v13, %v289_v15 }
  0x48   : > { %v338_v52 = vadd.f32 %v337_v50, %v336_v47  ;;  %v345_v53 = vadd.f32 %v344_v51, %v343_v49 }
  0x49   : > { %v294_v17 = vsub.f32 %v270_v0, %v292_v16 }
  0x4a   : > { %v339_v54 = vrot.slane %v338_v52, 1  ;;  %v346_v55 = vrot.slane %v345_v53, 1 }
  0x4b   : > { %v295_v19 = vmul.f32 1.442695, %v294_v17 }
  0x4c   : > { %v340_v60 = vadd.f32 %v339_v54, %v338_v52  ;;  %v347_v0 = vadd.f32 %v346_v55, %v345_v53 }
  0x4d   : > { %630 = vpow2.f32 %v295_v19  ;;  %v403_v19 = vsel %vm381_vm4, %v399_v12, 0.0 }
  0x4e   : > { %v404_v22 = vadd.f32 %v403_v19, %v402_v18 }
  0x5a   : > { %v631_v26 = vpop.eup %630 }
  0x5b   : > { %v298_v27 = vcombine.high %v631_v26, %v631_v26  ;;  %v300_v28 = vsel %vm275_vm0, %v631_v26, 0.0 }
  0x5c   : > { %v301_v29 = vrot.slane %v300_v28, 4 }
  0x5d   : > { %v307_v31 = vsel %vm275_vm0, %v298_v27, 0.0 }
  0x5e   : > { %v302_v32 = vadd.f32 %v301_v29, %v300_v28  ;;  %v308_v33 = vrot.slane %v307_v31, 4 }
  0x60   : > { %v303_v36 = vrot.slane %v302_v32, 2  ;;  %v309_v37 = vadd.f32 %v308_v33, %v307_v31 }
  0x62   : > { %v304_v39 = vadd.f32 %v303_v36, %v302_v32  ;;  %v310_v40 = vrot.slane %v309_v37, 2 }
  0x64   : > { %v305_v42 = vrot.slane %v304_v39, 1  ;;  %v311_v43 = vadd.f32 %v310_v40, %v309_v37 }
  0x66   : > { %v306_v45 = vadd.f32 %v305_v42, %v304_v39  ;;  %v312_v46 = vrot.slane %v311_v43, 1 }
  0x68   : > { %v313_v48 = vadd.f32 %v312_v46, %v311_v43  ;;  %632 = vlog2.f32 %v306_v45 }
  0x6a   : > { %634 = vlog2.f32 %v313_v48 }
  0x75   : > { %v633_v58 = vpop.eup %632 }
  0x76   : > { %v315_v59 = vmul.f32 0.6931472, %v633_v58 }
  0x77   : > { %v635_v61 = vpop.eup %634 }
  0x78   : > { %v317_v62 = vmul.f32 0.6931472, %v635_v61  ;;  %v318_v63 = vadd.f32 %v315_v59, %v282_v13 }
  0x7a   : > { %v319_v2 = vadd.f32 %v317_v62, %v289_v15  ;;  %v349_v3 = vsub.f32 %v318_v63, %v340_v60 }
  0x7c   : > { %v350_v4 = vsub.f32 %v319_v2, %v347_v0 }
  0x7e   : > { %v353_v6 = vcombine.low %v349_v3, %v350_v4 }
  0x80   : > { %v360_v7 = vrot.slane %v353_v6, %v359_v5 }
  0x82   : > { %v367_v10 = vrot.slane %v360_v7, %v359_v5 }
  0x84   : > { %v369_v14 = vsel %vm348_vm3, %v367_v10, 0.0 }
  0x85   : > { %v374_v13 = vrot.slane %v369_v14, %v879_v21  ;;  %v378_v15 = vrot.slane %v369_v14, %v881_v23 }
  0x87   : > { %v382_v16 = vsel %vm381_vm4, %v374_v13, 0.0  ;;  %v383_v17 = vsel %vm381_vm4, %v378_v15, 0.0 }
  0x88   : > { %v384_v20 = vadd.f32 %v383_v17, %v382_v16 }
  0x8a   : > { %385 = vadd.xlane.f32.xlu0 %v384_v20 }
  0x8e   : > { %405 = vadd.xlane.f32.xlu0 %v404_v22 }
 0x113   : > { %v386_v24 = vpop.xlane.xlu0 %385 }
 0x114   : > { %388 = vst.msk [vmem:[%s263_s12] sm:$0x1] %vm387_vm5, %v386_v24 }
 0x117   : > { %v406_v21 = vpop.xlane.xlu0 %405 }
 0x118   : > { %407 = vst.msk [vmem:[%s269_s26] sm:$0x1] %vm387_vm5, %v406_v21 }
 0x119 PF: > { %s20_s17 = sadd.s32 1, %s746_s17   ;;  %s927_s12 = smov %s730_s13 }
 0x11a   : > { %p17_p9 = scmp.ge.s32.totalorder %s20_s17, 4   ;;  %s928_s13 = smov %s734_s14 }
 0x11b   : > { %s929_s14 = smov %s821_s24  ;;  %s930_s15 = smov %s742_s16 }
 0x11c   : > { %s931_s16 = smov %s933_s19  ;;  %19 = sbr.rel (!%p17_p9) target bundleno = 6 (0x6), region = 93 }
 0x121   :  { %449 = vsyncpa [#allocation3], 1 }
 0x122   :  { %451 = vsyncpa [#allocation3 + $0x1], 1 }
 0x123   :  { %452 = vsyncpa [#allocation5], 1 }
 0x124   :  { %454 = vsyncpa [#allocation5 + $0x1], 1 }

</bundles_post_ra>
